<compile_context>
chip_gen: v7x
topology: tpu7x:2x2x1
jax: 0.10.0
libtpu: 0.0.40
codegen_flags: <defaults>
</compile_context>

<pallas_src>
import jax
import jax.numpy as jnp
from jax.experimental import pallas as pl
from jax.experimental.pallas import tpu as pltpu


# ----------------------------------------------------------------------------
# Fused kernel: one graph per grid step, everything resident in VMEM.
# ----------------------------------------------------------------------------
def _make_gcn_kernel(h2_valid, h2_padded):
    """Builds the fused 2-layer GCN + softmax kernel for a padded width."""

    def kernel(adj_ref, x_ref, w1_ref, w2_ref, out_ref):
        # Layer 1: h1 = relu(adj @ (x @ w1))   (dropout = 0.0 -> identity)
        # bf16 operands on the MXU, f32 accumulation.
        xw1 = jnp.dot(x_ref[...], w1_ref[...],
                      preferred_element_type=jnp.float32)
        h1 = jnp.maximum(
            jnp.dot(adj_ref[...], xw1.astype(jnp.bfloat16),
                    preferred_element_type=jnp.float32), 0.0)

        # Layer 2: h2 = relu(adj @ (h1 @ w2_padded)) on the lane-padded tile.
        h1w2 = jnp.dot(h1.astype(jnp.bfloat16), w2_ref[...],
                       preferred_element_type=jnp.float32)
        h2 = jnp.maximum(
            jnp.dot(adj_ref[...], h1w2.astype(jnp.bfloat16),
                    preferred_element_type=jnp.float32), 0.0)

        # Row-wise softmax over the valid feature lanes (f32 on VPU/EUP).
        if h2_padded != h2_valid:
            lane = jax.lax.broadcasted_iota(jnp.int32, h2.shape, 1)
            valid = lane < h2_valid
            z = jnp.where(valid, h2, -jnp.inf)
        else:
            valid = None
            z = h2
        m = jnp.max(z, axis=-1, keepdims=True)
        e = jnp.exp(z - m)
        if valid is not None:
            e = jnp.where(valid, e, 0.0)           # padded lanes store exact 0
        denom = jnp.sum(e, axis=-1, keepdims=True)
        # NOTE: approx reciprocal (EUP vrcp) => rows sum to 1 only to ~1e-3.
        out_ref[...] = (e * pl.reciprocal(denom, approx=True)).astype(out_ref.dtype)

    return kernel


# ----------------------------------------------------------------------------
# Wrapper
# ----------------------------------------------------------------------------
def _vmem_capacity_bytes():
    """Generation-aware physical VMEM capacity, conservative fallback."""
    try:
        info = pltpu.get_tpu_info()
        return int(getattr(info, "vmem_capacity_bytes", 64 * 1024 * 1024))
    except Exception:
        return 64 * 1024 * 1024          # v7x per-TC worst case


def gcn_forward(adj, inputs, w1, w2):
    """out = softmax(relu(adj @ (relu(adj @ (inputs @ w1)) @ w2)))  per graph.

    adj: (N, N) or (B, N, N); inputs: (N, F) or (B, N, F); weights shared.
    """
    squeeze = adj.ndim == 2
    if squeeze:
        adj, inputs = adj[None], inputs[None]

    B, N, N2 = adj.shape
    assert N == N2
    Bx, Nx, F = inputs.shape
    assert Bx == B and Nx == N
    F2, H1 = w1.shape
    assert F2 == F
    H1b, H2 = w2.shape
    assert H1b == H1

    # Lane-dense padding of the output feature axis to a multiple of 128.
    H2P = ((H2 + 127) // 128) * 128
    w2p = w2 if H2P == H2 else jnp.pad(w2, ((0, 0), (0, H2P - H2)))

    # bf16 MXU operands (halves VMEM/HBM footprint of adj, the big operand).
    adj_b = adj.astype(jnp.bfloat16)
    x_b = inputs.astype(jnp.bfloat16)
    w1_b = w1.astype(jnp.bfloat16)
    w2_b = w2p.astype(jnp.bfloat16)

    # Generation-aware VMEM budget (double-buffered blocks + f32 temporaries).
    cap = _vmem_capacity_bytes()
    needed = (
        2 * 2 * (N * N + N * F + F * H1 + H1 * H2P)   # double-buffered bf16 inputs
        + 2 * 4 * (N * H2P)                           # double-buffered f32 output
        + 4 * (2 * N * H1 + 3 * N * H2P)              # xw1/h1 + h1w2/h2/e temporaries
    )
    budget = int(cap * 0.75)                          # headroom for compiler scratch
    assert needed < budget, (
        f"per-graph working set {needed} B exceeds VMEM budget {budget} B; "
        "needs the tiled large-graph path")
    vmem_limit = min(budget, max(2 * needed, 32 * 1024 * 1024))

    out_p = pl.pallas_call(
        _make_gcn_kernel(H2, H2P),
        out_shape=jax.ShapeDtypeStruct((B, N, H2P), jnp.float32),
        grid=(B,),
        in_specs=[
            pl.BlockSpec((None, N, N), lambda b: (b, 0, 0)),
            pl.BlockSpec((None, N, F), lambda b: (b, 0, 0)),
            pl.BlockSpec((F, H1), lambda b: (0, 0)),
            pl.BlockSpec((H1, H2P), lambda b: (0, 0)),
        ],
        out_specs=pl.BlockSpec((None, N, H2P), lambda b: (b, 0, 0)),
        compiler_params=pltpu.CompilerParams(
            dimension_semantics=("parallel",),
            vmem_limit_bytes=vmem_limit,
        ),
    )(adj_b, x_b, w1_b, w2_b)

    out = out_p if H2P == H2 else out_p[..., :H2]
    return out[0] if squeeze else out


def glorot(key, shape):
    limit = jnp.sqrt(6.0 / (shape[0] + shape[1]))
    return jax.random.uniform(key, shape, jnp.float32, -limit, limit)


def _reference_forward(adj, x, w1, w2):
    """Pure-JAX reference with the same bf16-operand / f32-accumulate dots."""
    bf16, f32 = jnp.bfloat16, jnp.float32
    xw1 = jnp.einsum("bnf,fh->bnh", x.astype(bf16), w1.astype(bf16),
                     preferred_element_type=f32)
    h1 = jnp.maximum(jnp.einsum("bnm,bmh->bnh", adj.astype(bf16),
                                xw1.astype(bf16), preferred_element_type=f32), 0.0)
    h1w2 = jnp.einsum("bnh,hk->bnk", h1.astype(bf16), w2.astype(bf16),
                      preferred_element_type=f32)
    h2 = jnp.maximum(jnp.einsum("bnm,bmk->bnk", adj.astype(bf16),
                                h1w2.astype(bf16), preferred_element_type=f32), 0.0)
    return jax.nn.softmax(h2, axis=-1)


# ----------------------------------------------------------------------------
# Main
# ----------------------------------------------------------------------------
if __name__ == "__main__":
    # Small, shape-consistent configuration:
    #   B graphs, N nodes, num_features, FLAGS.hidden1, FLAGS.hidden2
    B, N = 4, 128
    num_features, hidden1, hidden2 = 64, 64, 32

    key = jax.random.PRNGKey(0)
    k_adj, k_x, k_w1, k_w2 = jax.random.split(key, 4)

    # Batch of symmetric, row-normalized dense adjacencies (synthetic graphs).
    a = jax.random.uniform(k_adj, (B, N, N), jnp.float32)
    a = (a > 0.9).astype(jnp.float32)
    a = a + jnp.swapaxes(a, -1, -2) + jnp.eye(N, dtype=jnp.float32)
    a = jnp.minimum(a, 1.0)
    adj = a / jnp.sum(a, axis=-1, keepdims=True)

    inputs = jax.random.normal(k_x, (B, N, num_features), jnp.float32)

    # Deterministic parameter init (glorot uniform, as in the TF/PyTorch GCN).
    w1 = glorot(k_w1, (num_features, hidden1))
    w2 = glorot(k_w2, (hidden1, hidden2))

    out = jax.block_until_ready(gcn_forward(adj, inputs, w1, w2))
    assert out.shape == (B, N, hidden2)

    # Compare against the bf16-matched pure-JAX reference (approx vrcp + bf16).
    ref = _reference_forward(adj, inputs, w1, w2)
    max_err = float(jnp.max(jnp.abs(out - ref)))
    assert jnp.allclose(out, ref, atol=2e-3, rtol=2e-3), max_err
    # Rows sum to ~1 (approx reciprocal in the softmax denominator).
    assert jnp.allclose(jnp.sum(out, axis=-1), 1.0, atol=1e-2), "row sums off"

    # Also exercise the unbatched (single-graph) wrapper path.
    out0 = jax.block_until_ready(gcn_forward(adj[0], inputs[0], w1, w2))
    assert out0.shape == (N, hidden2)
    assert jnp.allclose(out0, ref[0], atol=2e-3, rtol=2e-3)

    print("KERNEL_OK")
</pallas_src>

<mosaic_0001>
module attributes {stable_mosaic.version = 11 : i64} {
  func.func @kernel(%arg0: i32, %arg1: memref<1x128x128xbf16, #tpu.memory_space<vmem>>, %arg2: memref<1x128x64xbf16, #tpu.memory_space<vmem>>, %arg3: memref<64x64xbf16, #tpu.memory_space<vmem>>, %arg4: memref<64x128xbf16, #tpu.memory_space<vmem>>, %arg5: memref<1x128x128xf32, #tpu.memory_space<vmem>>) attributes {dimension_semantics = [#tpu.dimension_semantics<parallel>], iteration_bounds = array<i64: 4>, scalar_prefetch = 0 : i64, scratch_operands = 0 : i64, tpu.core_type = #tpu.core_type<tc>, window_params = [{transform_indices = @transform_0, window_bounds = array<i64: 1, 128, 128>}, {transform_indices = @transform_1, window_bounds = array<i64: 1, 128, 64>}, {pipeline_mode = #tpu.pipeline_mode<synchronous>, transform_indices = @transform_2, window_bounds = array<i64: 64, 64>}, {pipeline_mode = #tpu.pipeline_mode<synchronous>, transform_indices = @transform_3, window_bounds = array<i64: 64, 128>}, {transform_indices = @transform_4, window_bounds = array<i64: 1, 128, 128>}]} {
    %c0 = arith.constant 0 : index
    %c0_0 = arith.constant 0 : index
    %c0_1 = arith.constant 0 : index
    %0 = vector.load %arg2[%c0, %c0_0, %c0_1] : memref<1x128x64xbf16, #tpu.memory_space<vmem>>, vector<1x128x64xbf16>
    %1 = vector.shape_cast %0 : vector<1x128x64xbf16> to vector<128x64xbf16>
    %c0_2 = arith.constant 0 : index
    %c0_3 = arith.constant 0 : index
    %2 = vector.load %arg3[%c0_2, %c0_3] : memref<64x64xbf16, #tpu.memory_space<vmem>>, vector<64x64xbf16>
    %cst = arith.constant dense<0.000000e+00> : vector<128x64xf32>
    %3 = tpu.matmul %1, %2, %cst {dimension_numbers = #tpu.dot_dimension_numbers<[1], [0], [0], [1], [0, 0, 1, 1], [], []>} : vector<128x64xbf16>, vector<64x64xbf16>, vector<128x64xf32> -> vector<128x64xf32>
    %c0_4 = arith.constant 0 : index
    %c0_5 = arith.constant 0 : index
    %c0_6 = arith.constant 0 : index
    %4 = vector.load %arg1[%c0_4, %c0_5, %c0_6] : memref<1x128x128xbf16, #tpu.memory_space<vmem>>, vector<1x128x128xbf16>
    %5 = vector.shape_cast %4 : vector<1x128x128xbf16> to vector<128x128xbf16>
    %6 = arith.truncf %3 : vector<128x64xf32> to vector<128x64xbf16>
    %cst_7 = arith.constant dense<0.000000e+00> : vector<128x64xf32>
    %7 = tpu.matmul %5, %6, %cst_7 {dimension_numbers = #tpu.dot_dimension_numbers<[1], [0], [0], [1], [0, 0, 1, 1], [], []>} : vector<128x128xbf16>, vector<128x64xbf16>, vector<128x64xf32> -> vector<128x64xf32>
    %cst_8 = arith.constant 0.000000e+00 : f32
    %8 = vector.broadcast %cst_8 : f32 to vector<128x64xf32>
    %9 = arith.maximumf %7, %8 : vector<128x64xf32>
    %10 = arith.truncf %9 : vector<128x64xf32> to vector<128x64xbf16>
    %c0_9 = arith.constant 0 : index
    %c0_10 = arith.constant 0 : index
    %11 = vector.load %arg4[%c0_9, %c0_10] : memref<64x128xbf16, #tpu.memory_space<vmem>>, vector<64x128xbf16>
    %cst_11 = arith.constant dense<0.000000e+00> : vector<128x128xf32>
    %12 = tpu.matmul %10, %11, %cst_11 {dimension_numbers = #tpu.dot_dimension_numbers<[1], [0], [0], [1], [0, 0, 1, 1], [], []>} : vector<128x64xbf16>, vector<64x128xbf16>, vector<128x128xf32> -> vector<128x128xf32>
    %c0_12 = arith.constant 0 : index
    %c0_13 = arith.constant 0 : index
    %c0_14 = arith.constant 0 : index
    %13 = vector.load %arg1[%c0_12, %c0_13, %c0_14] : memref<1x128x128xbf16, #tpu.memory_space<vmem>>, vector<1x128x128xbf16>
    %14 = vector.shape_cast %13 : vector<1x128x128xbf16> to vector<128x128xbf16>
    %15 = arith.truncf %12 : vector<128x128xf32> to vector<128x128xbf16>
    %cst_15 = arith.constant dense<0.000000e+00> : vector<128x128xf32>
    %16 = tpu.matmul %14, %15, %cst_15 {dimension_numbers = #tpu.dot_dimension_numbers<[1], [0], [0], [1], [0, 0, 1, 1], [], []>} : vector<128x128xbf16>, vector<128x128xbf16>, vector<128x128xf32> -> vector<128x128xf32>
    %cst_16 = arith.constant 0.000000e+00 : f32
    %17 = vector.broadcast %cst_16 : f32 to vector<128x128xf32>
    %18 = arith.maximumf %16, %17 : vector<128x128xf32>
    %19 = tpu.iota {dimensions = array<i32: 1>} : vector<128x128xi32>
    %c32_i32 = arith.constant 32 : i32
    %20 = vector.broadcast %c32_i32 : i32 to vector<128x128xi32>
    %21 = arith.cmpi slt, %19, %20 : vector<128x128xi32>
    %cst_17 = arith.constant 0xFF800000 : f32
    %22 = vector.broadcast %cst_17 : f32 to vector<128x128xf32>
    %23 = arith.select %21, %18, %22 : vector<128x128xi1>, vector<128x128xf32>
    %cst_18 = arith.constant dense<0xFF800000> : vector<128xf32>
    %24 = vector.multi_reduction <maximumf>, %23, %cst_18 [1] : vector<128x128xf32> to vector<128xf32>
    %25 = vector.shape_cast %24 : vector<128xf32> to vector<128x1xf32>
    %26 = vector.broadcast %25 : vector<128x1xf32> to vector<128x128xf32>
    %27 = arith.subf %23, %26 : vector<128x128xf32>
    %28 = math.exp %27 : vector<128x128xf32>
    %cst_19 = arith.constant 0.000000e+00 : f32
    %29 = vector.broadcast %cst_19 : f32 to vector<128x128xf32>
    %30 = arith.select %21, %28, %29 : vector<128x128xi1>, vector<128x128xf32>
    %cst_20 = arith.constant dense<0.000000e+00> : vector<128xf32>
    %31 = vector.multi_reduction <add>, %30, %cst_20 [1] : vector<128x128xf32> to vector<128xf32>
    %32 = vector.shape_cast %31 : vector<128xf32> to vector<128x1xf32>
    %33 = tpu.reciprocal %32 {approx = true} : vector<128x1xf32> -> vector<128x1xf32>
    %34 = vector.broadcast %33 : vector<128x1xf32> to vector<128x128xf32>
    %35 = arith.mulf %30, %34 : vector<128x128xf32>
    %c0_21 = arith.constant 0 : index
    %c0_22 = arith.constant 0 : index
    %c0_23 = arith.constant 0 : index
    %36 = vector.load %arg5[%c0_21, %c0_22, %c0_23] : memref<1x128x128xf32, #tpu.memory_space<vmem>>, vector<1x128x128xf32>
    %37 = vector.shape_cast %36 : vector<1x128x128xf32> to vector<128x128xf32>
    %38 = vector.shape_cast %35 : vector<128x128xf32> to vector<1x128x128xf32>
    tpu.vector_store %arg5[%c0_21, %c0_22, %c0_23], %38 {strides = array<i32>} : memref<1x128x128xf32, #tpu.memory_space<vmem>>, vector<1x128x128xf32>,
    return
  }
  func.func @transform_0(%arg0: i32) -> (i32, i32, i32) {
    %c0_i32 = arith.constant 0 : i32
    %c0_i32_0 = arith.constant 0 : i32
    %c0_i32_1 = arith.constant 0 : i32
    return %arg0, %c0_i32, %c0_i32_0 : i32, i32, i32
  }
  func.func @transform_1(%arg0: i32) -> (i32, i32, i32) {
    %c0_i32 = arith.constant 0 : i32
    %c0_i32_0 = arith.constant 0 : i32
    %c0_i32_1 = arith.constant 0 : i32
    return %arg0, %c0_i32, %c0_i32_0 : i32, i32, i32
  }
  func.func @transform_2(%arg0: i32) -> (i32, i32) {
    %c0_i32 = arith.constant 0 : i32
    %c0_i32_0 = arith.constant 0 : i32
    %c0_i32_1 = arith.constant 0 : i32
    return %c0_i32, %c0_i32_0 : i32, i32
  }
  func.func @transform_3(%arg0: i32) -> (i32, i32) {
    %c0_i32 = arith.constant 0 : i32
    %c0_i32_0 = arith.constant 0 : i32
    %c0_i32_1 = arith.constant 0 : i32
    return %c0_i32, %c0_i32_0 : i32, i32
  }
  func.func @transform_4(%arg0: i32) -> (i32, i32, i32) {
    %c0_i32 = arith.constant 0 : i32
    %c0_i32_0 = arith.constant 0 : i32
    %c0_i32_1 = arith.constant 0 : i32
    return %arg0, %c0_i32, %c0_i32_0 : i32, i32, i32
  }
}

</mosaic_0001>

<bundles_post_ra>
// kernel: tpu_custom_call.1
= control target key start
LH: loop header
LB: loop body
LE: loop exit
PB: predicated region body
PF: predicated region fallthrough
CT: control target
= control target key end

     0   :  { %9 = vsyncpa [#allocation3], 0  ;;  %s2012_s0 = inlined_call_operand.vmem [shape: bf16[4,128,128], index: 0, kind: input, shape index: {}]   ;;  %s2013_s1 = inlined_call_operand.vmem [shape: bf16[4,128,64], index: 1, kind: input, shape index: {}]   ;;  %s2014_s2 = inlined_call_operand.vmem [shape: bf16[64,64], index: 2, kind: input, shape index: {}]   ;;  %s2015_s3 = inlined_call_operand.vmem [shape: bf16[64,128], index: 3, kind: input, shape index: {}]   ;;  %s2016_s4 = inlined_call_operand.hbm [shape: f32[4,128,128], index: 4, kind: output, shape index: {}]  }
   0x1   :  { %11 = vsyncpa [#allocation3 + $0x1], 0  ;;  %s1639_s15 = smov 0   ;;  %s1641_s16 = smov 0  }
   0x2   :  { %s1643_s17 = smov 0   ;;  %s1645_s18 = smov 0  }
   0x3 LB: > { %s1660_s19 = sadd.s32 4294967295, %s1609_s18   ;;  %s1177_s20 = sadd.s32 4294967294, %s1609_s18   ;;  %s1609_s18 = sphi %s1645_s18, %s2022_s18   ;;  %s1605_s17 = sphi %s1643_s17, %s2021_s17   ;;  %s1601_s16 = sphi %s1641_s16, %s2020_s16   ;;  %s1597_s15 = sphi %s1639_s15, %s2019_s15  }
   0x4   : > { %s1664_s21 = sadd.s32 1, %s1609_s18   ;;  %s118_s22 = sadd.s32 1, %s1605_s17 }
   0x5   : > { %s115_s23 = ssub.s32 %s1609_s18, %s1664_s21  ;;  %p128_p0 = scmp.ne.s32.totalorder %s1605_s17, %s1601_s16 }
   0x6   : > { %p116_p1 = scmp.eq.s32.totalorder %s115_s23, 0  ;;  %p129_p2 = scmp.eq.s32.totalorder %s1660_s19, 3 }
   0x7   : > { %p134_p3 = scmp.ne.s32.totalorder %s1601_s16, %s1597_s15  ;;  %p135_p4 = scmp.eq.s32.totalorder %s1177_s20, 3 }
   0x8   : > { %s1675_s24 = scalar_select %p116_p1, %s1605_s17, %s118_s22  }
   0x9   : > { %p1677_p5 = por %p129_p2, %p128_p0  ;;  %p1681_p6 = por %p135_p4, %p134_p3 }
   0xa   : > { %p1180_p7 = scmp.ge.s32.totalorder %s1609_s18, 1  ;;  %p175_p8 = scmp.lt.s32.totalorder %s1609_s18, 5 }
   0xc   : > { %p176_p9 = pnand %p1180_p7, %p175_p8 }
   0xd   : > { %v1459_v0 = vld [vmem:[%s2014_s2] sm:$0xff] (!%p176_p9)   ;;  %p206_p10 = scmp.lt.s32.totalorder (!%p176_p9), %s1660_s19, 3  ;;  %v1460_v1 = vld [vmem:[%s2014_s2 + $0x8] sm:$0xff] (!%p176_p9)   ;;  %vm305_vm0 = vcmask (!%p176_p9), 523264   ;;  %v1461_v2 = vld [vmem:[%s2014_s2 + $0x10] sm:$0xff] (!%p176_p9)   ;;  %s1611_s23 = smov (!%p176_p9), [#allocation2]  }
   0xe   : > { %179 = sbr.rel (%p176_p9) target bundleno = 1323 (0x52b), region = 36  ;;  %1290 = vmatprep.subr.bf16.mxu0 (!%p176_p9), %v1459_v0  ;;  %v1462_v4 = vld [vmem:[%s2014_s2 + $0x18] sm:$0xff] (!%p176_p9)   ;;  %v1479_v13 = vld [vmem:[%s2015_s3] sm:$0xff] (!%p176_p9)   ;;  %v1480_v14 = vld [vmem:[%s2015_s3 + $0x8] sm:$0xff] (!%p176_p9)   ;;  %s1551_s27 = sshll.u32 (!%p176_p9), %s1611_s23, 4  ;;  %s1552_s27 = int_to_ptr.vmem [resolvable:$false] %s1551_s27 }
   0xf   : > { %1291 = vmatpush3.bf16.msra.mxu0 (!%p176_p9), %v1459_v0  ;;  %v1481_v15 = vld [vmem:[%s2015_s3 + $0x10] sm:$0xff] (!%p176_p9)   ;;  %v1482_v47 = vld [vmem:[%s2015_s3 + $0x18] sm:$0xff] (!%p176_p9)   ;;  %s1553_s28 = scalar_lea.vmem (!%p176_p9), %s1552_s27, 4096 }
  0x10   : > { %1292 = vmatprep.subr.bf16.mxu0 (!%p176_p9), %v1460_v1 }
  0x13   : > { %1293 = vmatpush3.bf16.msra.mxu0 (!%p176_p9), %v1460_v1 }
  0x14   : > { %1294 = vmatprep.subr.bf16.mxu0 (!%p176_p9), %v1461_v2 }
  0x15   : > { %s1695_s5 = scalar_select %p206_p10, %s1660_s19, 3 }
  0x17   : > { %s1231_s8 = sshll.u32 %s1695_s5, 6  ;;  %1295 = vmatpush3.bf16.msra.mxu0 %v1461_v2 }
  0x18   : > { %s215_s11 = scalar_lea.vmem %s2013_s1, %s1231_s8  ;;  %1296 = vmatprep.subr.bf16.mxu0 %v1462_v4  ;;  %s1718_s22 = scalar_lea.vmem %s2012_s0, %s1231_s8 }
  0x19   : > { %v1463_v3 = vld [vmem:[%s215_s11] sm:$0xff]   ;;  %v1464_v5 = vld [vmem:[%s215_s11 + $0x8] sm:$0xff]   ;;  %v1465_v6 = vld [vmem:[%s215_s11 + $0x10] sm:$0xff]   ;;  %s203_s8 = sand.u32 1, %s1601_s16  }
  0x1a   : > { %1298 = vmatprep.mubr.msk.bf16.mxu0 %vm305_vm0, %v1463_v3  ;;  %v1466_v7 = vld [vmem:[%s215_s11 + $0x18] sm:$0xff]   ;;  %v1467_v8 = vld [vmem:[%s215_s11 + $0x20] sm:$0xff]   ;;  %v1468_v9 = vld [vmem:[%s215_s11 + $0x28] sm:$0xff]   ;;  %s1181_s9 = sshll.u32 %s203_s8, 7 }
  0x1b   : > { %1297 = vmatpush3.bf16.msra.mxu0 %v1462_v4  ;;  %v1469_v10 = vld [vmem:[%s215_s11 + $0x30] sm:$0xff]   ;;  %v1470_v11 = vld [vmem:[%s215_s11 + $0x38] sm:$0xff]   ;;  %v1721_v12 = vld [vmem:[%s1718_s22] sm:$0xff]   ;;  %s1927_s10 = scalar_lea.vmem [#allocation2], %s1181_s9  ;;  %s1233_s11 = sshll.u32 %s1660_s19, 11 }
  0x1c   : > { %1330 = vmatprep.mubr.bf16.mxu1 %v1721_v12  ;;  %1346 = vmatprep.subr.bf16.mxu0 %v1479_v13  ;;  %v1734_v40 = vld [vmem:[%s1718_s22 + $0x8] sm:$0xff]   ;;  %v1473_v41 = vld [vmem:[%s1718_s22 + $0x10] sm:$0xff]   ;;  %v1739_v42 = vld [vmem:[%s1718_s22 + $0x18] sm:$0xff]   ;;  %s1103_s12 = sshll.u32 %s1927_s10, 4  ;;  %s1963_s20 = scalar_lea.hbm %s2016_s4, %s1233_s11  ;;  %s1965_s12 = int_to_ptr.vmem [resolvable:$true] %s1103_s12 }
  0x1d   : > { %v1742_v43 = vld [vmem:[%s1718_s22 + $0x20] sm:$0xff]   ;;  %v1747_v44 = vld [vmem:[%s1718_s22 + $0x28] sm:$0xff]   ;;  %v1750_v45 = vld [vmem:[%s1718_s22 + $0x30] sm:$0xff]   ;;  %s1971_s19 = scalar_lea.sflag [#allocation3], %s203_s8  ;;  %p1554_p0 = scmp.lt.s32.totalorder %s1965_s12, %s1552_s27 }
  0x1e   : > { %1299 = vmatmul.mubr.msk.bf16.vlgmr.msra.gmra.mrb[0].mxu0 %vm305_vm0, %v1464_v5  ;;  %v1755_v46 = vld [vmem:[%s1718_s22 + $0x38] sm:$0xff]   ;;  %s1547_s22 = scalar_lea.vmem %s1965_s12, 2048 }
  0x1f   : > { %1302 = vmatprep.mubr.msk.bf16.mxu0 %vm305_vm0, %v1465_v6  ;;  %1347 = vmatpush3.bf16.msra.mxu0 %v1479_v13  ;;  %p1548_p11 = scmp.ne.s32.totalorder %s1965_s12, %s1547_s22  ;;  %p1555_p1 = scmp.lt.s32.totalorder %s1553_s28, %s1547_s22 }
  0x20   : > { %1348 = vmatprep.subr.bf16.mxu0 %v1480_v14 }
  0x21   : > { %p1549_p12 = pnand %p1548_p11, %p1677_p5  ;;  %p1556_p2 = por %p1555_p1, %p1554_p0 }
  0x23   : > { %1349 = vmatpush3.bf16.msra.mxu0 %v1480_v14  ;;  %p1550_p13 = pneg %p1549_p12 }
  0x24   : > { %1350 = vmatprep.subr.bf16.mxu0 %v1481_v15 }
  0x25   : > { %p1557_p3 = pnand %p1556_p2, %p1550_p13 }
  0x26   : > { %1303 = vmatmul.mubr.msk.bf16.gmra.mrb[4].mxu0 %vm305_vm0, %v1466_v7 }
  0x27   : > { %1306 = vmatprep.mubr.msk.bf16.mxu0 %vm305_vm0, %v1467_v8  ;;  %1351 = vmatpush3.bf16.msra.mxu0 %v1481_v15 }
  0x28   : > { %1352 = vmatprep.subr.bf16.mxu0 %v1482_v47 }
  0x2b   : > { %1353 = vmatpush3.bf16.msra.mxu0 %v1482_v47 }
  0x2e   : > { %1307 = vmatmul.mubr.msk.bf16.gmra.mrb[8].mxu0 %vm305_vm0, %v1468_v9 }
  0x2f   : > { %1310 = vmatprep.mubr.msk.bf16.mxu0 %vm305_vm0, %v1469_v10 }
  0x36   : > { %1311 = vmatmul.mubr.msk.bf16.gmra.mrb[12].mxu0 %vm305_vm0, %v1470_v11 }
  0xf1   : > { %v1300_v16 = vpop.f32.mrb[0].mxu0 }
  0xf2   : > { %v364_v17 = vpop.f32.mrb[1].mxu0 }
  0xf3   : > { %v1301_v18 = vpop.f32.mrb[2].mxu0 }
  0xf4   : > { %v444_v19 = vpack.c.bf16 %v1301_v18, %v1300_v16  ;;  %v367_v20 = vpop.f32.mrb[3].mxu0 }
  0xf5   : > { %v443_v21 = vpack.c.bf16 %v367_v20, %v364_v17 }
  0xf7   : > { %1314 = vmatprep.subr.bf16.mxu1 %v443_v21 }
  0xf8   : > { %1315 = vmatpush3.bf16.msra.mxu1 %v443_v21 }
  0xf9   : > { %v1304_v22 = vpop.f32.mrb[4].mxu0  ;;  %1316 = vmatprep.subr.bf16.mxu1 %v444_v19 }
  0xfa   : > { %v380_v23 = vpop.f32.mrb[5].mxu0 }
  0xfb   : > { %v1305_v24 = vpop.f32.mrb[6].mxu0 }
  0xfc   : > { %v446_v25 = vpack.c.bf16 %v1305_v24, %v1304_v22  ;;  %v383_v26 = vpop.f32.mrb[7].mxu0  ;;  %1317 = vmatpush3.bf16.msra.mxu1 %v444_v19 }
  0xfd   : > { %v445_v27 = vpack.c.bf16 %v383_v26, %v380_v23 }
  0xff   : > { %1318 = vmatprep.subr.bf16.mxu1 %v445_v27 }
 0x100   : > { %1319 = vmatpush3.bf16.msra.mxu1 %v445_v27 }
 0x101   : > { %v1308_v28 = vpop.f32.mrb[8].mxu0  ;;  %1320 = vmatprep.subr.bf16.mxu1 %v446_v25 }
 0x102   : > { %v396_v29 = vpop.f32.mrb[9].mxu0 }
 0x103   : > { %v1309_v30 = vpop.f32.mrb[10].mxu0 }
 0x104   : > { %v448_v31 = vpack.c.bf16 %v1309_v30, %v1308_v28  ;;  %v399_v32 = vpop.f32.mrb[11].mxu0  ;;  %1321 = vmatpush3.bf16.msra.mxu1 %v446_v25 }
 0x105   : > { %v447_v33 = vpack.c.bf16 %v399_v32, %v396_v29 }
 0x107   : > { %1322 = vmatprep.subr.bf16.mxu1 %v447_v33 }
 0x108   : > { %1323 = vmatpush3.bf16.msra.mxu1 %v447_v33 }
 0x109   : > { %v1312_v34 = vpop.f32.mrb[12].mxu0  ;;  %1324 = vmatprep.subr.bf16.mxu1 %v448_v31 }
 0x10a   : > { %v412_v35 = vpop.f32.mrb[13].mxu0 }
 0x10b   : > { %v1313_v36 = vpop.f32.mrb[14].mxu0 }
 0x10c   : > { %v450_v37 = vpack.c.bf16 %v1313_v36, %v1312_v34  ;;  %v415_v38 = vpop.f32.mrb[15].mxu0  ;;  %1325 = vmatpush3.bf16.msra.mxu1 %v448_v31 }
 0x10d   : > { %v449_v39 = vpack.c.bf16 %v415_v38, %v412_v35 }
 0x10f   : > { %1326 = vmatprep.subr.bf16.mxu1 %v449_v39 }
 0x110   : > { %1327 = vmatpush3.bf16.msra.mxu1 %v449_v39 }
 0x111   : > { %1328 = vmatprep.subr.bf16.mxu1 %v450_v37 }
 0x114   : > { %1329 = vmatpush3.bf16.msra.mxu1 %v450_v37 }
 0x117   : > { %1331 = vmatmul.mubr.bf16.vlgmr.msra.gmra.mrb[0].mxu1 %v1734_v40 }
 0x118   : > { %1334 = vmatprep.mubr.bf16.mxu1 %v1473_v41 }
 0x11f   : > { %1335 = vmatmul.mubr.bf16.gmra.mrb[4].mxu1 %v1739_v42 }
 0x120   : > { %1338 = vmatprep.mubr.bf16.mxu1 %v1742_v43 }
 0x127   : > { %1339 = vmatmul.mubr.bf16.gmra.mrb[8].mxu1 %v1747_v44 }
 0x128   : > { %1342 = vmatprep.mubr.bf16.mxu1 %v1750_v45 }
 0x12f   : > { %1343 = vmatmul.mubr.bf16.gmra.mrb[12].mxu1 %v1755_v46 }
 0x130   : > { %1390 = vmatprep.mubr.bf16.mxu1 %v1473_v41 }
 0x1ea   : > { %v1332_v48 = vpop.f32.mrb[0].mxu1 }
 0x1eb   : > { %v533_v49 = vpop.f32.mrb[1].mxu1  ;;  %v598_v51 = vmax.f32 %v1332_v48, 0.0 }
 0x1ec   : > { %v1333_v50 = vpop.f32.mrb[2].mxu1  ;;  %v596_v54 = vmax.f32 %v533_v49, 0.0 }
 0x1ed   : > { %v599_v52 = vmax.f32 %v1333_v50, 0.0  ;;  %v536_v53 = vpop.f32.mrb[3].mxu1 }
 0x1ee   : > { %v597_v55 = vmax.f32 %v536_v53, 0.0 }
 0x1ef   : > { %v613_v56 = vpack.c.bf16 %v599_v52, %v598_v51 }
 0x1f0   : > { %v612_v57 = vpack.c.bf16 %v597_v55, %v596_v54  ;;  %v894_v54 = vlaneseq }
 0x1f2   : > { %v1336_v58 = vpop.f32.mrb[4].mxu1  ;;  %1354 = vmatprep.mubr.msk.bf16.mxu0 %vm305_vm0, %v612_v57  ;;  %v1776_v55 = vand.u32 127, %v894_v54 }
 0x1f3   : > { %v549_v59 = vpop.f32.mrb[5].mxu1  ;;  %1355 = vmatmul.mubr.msk.bf16.vlgmr.msra.gmra.mrb[16].mxu0 %vm305_vm0, %v613_v56  ;;  %v602_v61 = vmax.f32 %v1336_v58, 0.0 }
 0x1f4   : > { %v1337_v60 = vpop.f32.mrb[6].mxu1  ;;  %v600_v0 = vmax.f32 %v549_v59, 0.0  ;;  %vm896_vm1 = vcmp.lt.s32.totalorder %v1776_v55, 32 }
 0x1f5   : > { %v603_v62 = vmax.f32 %v1337_v60, 0.0  ;;  %v552_v63 = vpop.f32.mrb[7].mxu1 }
 0x1f6   : > { %v601_v1 = vmax.f32 %v552_v63, 0.0 }
 0x1f7   : > { %v615_v2 = vpack.c.bf16 %v603_v62, %v602_v61 }
 0x1f8   : > { %v614_v3 = vpack.c.bf16 %v601_v1, %v600_v0 }
 0x1fa   : > { %v1340_v4 = vpop.f32.mrb[8].mxu1  ;;  %1358 = vmatprep.mubr.msk.bf16.mxu0 %vm305_vm0, %v614_v3 }
 0x1fb   : > { %v565_v5 = vpop.f32.mrb[9].mxu1  ;;  %1359 = vmatmul.mubr.msk.bf16.gmra.mrb[20].mxu0 %vm305_vm0, %v615_v2  ;;  %v606_v7 = vmax.f32 %v1340_v4, 0.0 }
 0x1fc   : > { %v1341_v6 = vpop.f32.mrb[10].mxu1  ;;  %v604_v10 = vmax.f32 %v565_v5, 0.0 }
 0x1fd   : > { %v607_v8 = vmax.f32 %v1341_v6, 0.0  ;;  %v568_v9 = vpop.f32.mrb[11].mxu1 }
 0x1fe   : > { %v605_v11 = vmax.f32 %v568_v9, 0.0 }
 0x1ff   : > { %v617_v13 = vpack.c.bf16 %v607_v8, %v606_v7 }
 0x200   : > { %v616_v14 = vpack.c.bf16 %v605_v11, %v604_v10 }
 0x202   : > { %v1344_v15 = vpop.f32.mrb[12].mxu1  ;;  %1362 = vmatprep.mubr.msk.bf16.mxu0 %vm305_vm0, %v616_v14 }
 0x203   : > { %v581_v16 = vpop.f32.mrb[13].mxu1  ;;  %1363 = vmatmul.mubr.msk.bf16.gmra.mrb[24].mxu0 %vm305_vm0, %v617_v13  ;;  %v610_v18 = vmax.f32 %v1344_v15, 0.0 }
 0x204   : > { %v1345_v17 = vpop.f32.mrb[14].mxu1  ;;  %v608_v21 = vmax.f32 %v581_v16, 0.0 }
 0x205   : > { %v611_v19 = vmax.f32 %v1345_v17, 0.0  ;;  %v584_v20 = vpop.f32.mrb[15].mxu1 }
 0x206   : > { %v609_v22 = vmax.f32 %v584_v20, 0.0 }
 0x207   : > { %v619_v23 = vpack.c.bf16 %v611_v19, %v610_v18 }
 0x208   : > { %v618_v24 = vpack.c.bf16 %v609_v22, %v608_v21 }
 0x20a   : > { %1366 = vmatprep.mubr.msk.bf16.mxu0 %vm305_vm0, %v618_v24 }
 0x20b   : > { %1367 = vmatmul.mubr.msk.bf16.gmra.mrb[28].mxu0 %vm305_vm0, %v619_v23 }
 0x20c   : > { %1386 = vmatprep.mubr.bf16.mxu0 %v1721_v12 }
 0x2c6   : > { %v1356_v25 = vpop.f32.mrb[16].mxu0 }
 0x2c7   : > { %v710_v26 = vpop.f32.mrb[17].mxu0 }
 0x2c8   : > { %v1357_v27 = vpop.f32.mrb[18].mxu0 }
 0x2c9   : > { %v774_v28 = vpack.c.bf16 %v1357_v27, %v1356_v25  ;;  %v713_v29 = vpop.f32.mrb[19].mxu0 }
 0x2ca   : > { %v773_v30 = vpack.c.bf16 %v713_v29, %v710_v26 }
 0x2cc   : > { %1370 = vmatprep.subr.bf16.mxu0 %v773_v30  ;;  %1402 = vmatprep.subr.bf16.mxu1 %v773_v30 }
 0x2cd   : > { %1371 = vmatpush3.bf16.msra.mxu0 %v773_v30  ;;  %1410 = vmatpush3.bf16.msra.mxu1 %v773_v30 }
 0x2ce   : > { %v1360_v31 = vpop.f32.mrb[20].mxu0  ;;  %1372 = vmatprep.subr.bf16.mxu0 %v774_v28  ;;  %1403 = vmatprep.subr.bf16.mxu1 %v774_v28 }
 0x2cf   : > { %v726_v32 = vpop.f32.mrb[21].mxu0 }
 0x2d0   : > { %v1361_v33 = vpop.f32.mrb[22].mxu0 }
 0x2d1   : > { %v776_v34 = vpack.c.bf16 %v1361_v33, %v1360_v31  ;;  %v729_v35 = vpop.f32.mrb[23].mxu0  ;;  %1373 = vmatpush3.bf16.msra.mxu0 %v774_v28  ;;  %1411 = vmatpush3.bf16.msra.mxu1 %v774_v28 }
 0x2d2   : > { %v775_v12 = vpack.c.bf16 %v729_v35, %v726_v32 }
 0x2d4   : > { %1374 = vmatprep.subr.bf16.mxu0 %v775_v12  ;;  %1404 = vmatprep.subr.bf16.mxu1 %v775_v12 }
 0x2d5   : > { %1375 = vmatpush3.bf16.msra.mxu0 %v775_v12  ;;  %1412 = vmatpush3.bf16.msra.mxu1 %v775_v12 }
 0x2d6   : > { %v1364_v36 = vpop.f32.mrb[24].mxu0  ;;  %1376 = vmatprep.subr.bf16.mxu0 %v776_v34  ;;  %1405 = vmatprep.subr.bf16.mxu1 %v776_v34 }
 0x2d7   : > { %v742_v37 = vpop.f32.mrb[25].mxu0 }
 0x2d8   : > { %v1365_v38 = vpop.f32.mrb[26].mxu0 }
 0x2d9   : > { %v778_v39 = vpack.c.bf16 %v1365_v38, %v1364_v36  ;;  %v745_v41 = vpop.f32.mrb[27].mxu0  ;;  %1377 = vmatpush3.bf16.msra.mxu0 %v776_v34  ;;  %1413 = vmatpush3.bf16.msra.mxu1 %v776_v34 }
 0x2da   : > { %v777_v47 = vpack.c.bf16 %v745_v41, %v742_v37 }
 0x2dc   : > { %1378 = vmatprep.subr.bf16.mxu0 %v777_v47  ;;  %1406 = vmatprep.subr.bf16.mxu1 %v777_v47 }
 0x2dd   : > { %1379 = vmatpush3.bf16.msra.mxu0 %v777_v47  ;;  %1414 = vmatpush3.bf16.msra.mxu1 %v777_v47 }
 0x2de   : > { %v1368_v48 = vpop.f32.mrb[28].mxu0  ;;  %1380 = vmatprep.subr.bf16.mxu0 %v778_v39  ;;  %1407 = vmatprep.subr.bf16.mxu1 %v778_v39 }
 0x2df   : > { %v758_v49 = vpop.f32.mrb[29].mxu0 }
 0x2e0   : > { %v1369_v50 = vpop.f32.mrb[30].mxu0 }
 0x2e1   : > { %v780_v51 = vpack.c.bf16 %v1369_v50, %v1368_v48  ;;  %v761_v52 = vpop.f32.mrb[31].mxu0  ;;  %1381 = vmatpush3.bf16.msra.mxu0 %v778_v39  ;;  %1415 = vmatpush3.bf16.msra.mxu1 %v778_v39 }
 0x2e2   : > { %v779_v53 = vpack.c.bf16 %v761_v52, %v758_v49 }
 0x2e4   : > { %1382 = vmatprep.subr.bf16.mxu0 %v779_v53  ;;  %1408 = vmatprep.subr.bf16.mxu1 %v779_v53 }
 0x2e5   : > { %1383 = vmatpush3.bf16.msra.mxu0 %v779_v53  ;;  %1416 = vmatpush3.bf16.msra.mxu1 %v779_v53 }
 0x2e6   : > { %1384 = vmatprep.subr.bf16.mxu0 %v780_v51  ;;  %1409 = vmatprep.subr.bf16.mxu1 %v780_v51 }
 0x2e9   : > { %1385 = vmatpush3.bf16.msra.mxu0 %v780_v51  ;;  %1417 = vmatpush3.bf16.msra.mxu1 %v780_v51 }
 0x2ec   : > { %1387 = vmatmul.mubr.bf16.vlgmr.msra.gmra.mrb[32].mxu0 %v1734_v40  ;;  %1391 = vmatmul.mubr.bf16.vlgmr.msra.gmra.mrb[16].mxu1 %v1739_v42 }
 0x2ed   : > { %1394 = vmatprep.mubr.bf16.mxu1 %v1742_v43 }
 0x2f4   : > { %1395 = vmatmul.mubr.bf16.gmra.mrb[20].mxu1 %v1747_v44 }
 0x2f5   : > { %1398 = vmatprep.mubr.bf16.mxu1 %v1750_v45 }
 0x2fc   : > { %1399 = vmatmul.mubr.bf16.gmra.mrb[24].mxu1 %v1755_v46 }
 0x3bf   : > { %v1388_v56 = vpop.f32.mrb[32].mxu0  ;;  %v1392_v57 = vpop.f32.mrb[16].mxu1 }
 0x3c0   : > { %v880_v58 = vmax.f32 %v1388_v56, 0.0  ;;  %v884_v59 = vmax.f32 %v1392_v57, 0.0  ;;  %v815_v40 = vpop.f32.mrb[33].mxu0  ;;  %v831_v60 = vpop.f32.mrb[17].mxu1 }
 0x3c1   : > { %v1389_v42 = vpop.f32.mrb[34].mxu0  ;;  %v1393_v61 = vpop.f32.mrb[18].mxu1  ;;  %v878_v43 = vmax.f32 %v815_v40, 0.0  ;;  %v882_v0 = vmax.f32 %v831_v60, 0.0 }
 0x3c2   : > { %v881_v62 = vmax.f32 %v1389_v42, 0.0  ;;  %v818_v44 = vpop.f32.mrb[35].mxu0  ;;  %v834_v63 = vpop.f32.mrb[19].mxu1  ;;  %v903_v45 = vsel %vm896_vm1, %v884_v59, -inf  ;;  %v899_v46 = vsel %vm896_vm1, %v880_v58, -inf  ;;  %v885_v1 = vmax.f32 %v1393_v61, 0.0 }
 0x3c3   : > { %925 = vmax.xlane.f32.xlu0 %v903_v45  ;;  %917 = vmax.xlane.f32.xlu1 %v899_v46  ;;  %v897_v2 = vsel %vm896_vm1, %v878_v43, -inf  ;;  %v879_v7 = vmax.f32 %v818_v44, 0.0  ;;  %v883_v8 = vmax.f32 %v834_v63, 0.0  ;;  %v901_v9 = vsel %vm896_vm1, %v882_v0, -inf }
 0x3c4   : > { %v900_v3 = vsel %vm896_vm1, %v881_v62, -inf  ;;  %v904_v10 = vsel %vm896_vm1, %v885_v1, -inf }
 0x3c5   : > { %v902_v15 = vsel %vm896_vm1, %v883_v8, -inf  ;;  %v898_v16 = vsel %vm896_vm1, %v879_v7, -inf }
 0x3c7   : > { %913 = vmax.xlane.f32.xlu0 %v897_v2  ;;  %919 = vmax.xlane.f32.xlu1 %v900_v3  ;;  %v1396_v4 = vpop.f32.mrb[20].mxu1 }
 0x3c8   : > { %v847_v5 = vpop.f32.mrb[21].mxu1  ;;  %v888_v13 = vmax.f32 %v1396_v4, 0.0 }
 0x3c9   : > { %v1397_v6 = vpop.f32.mrb[22].mxu1  ;;  %v886_v22 = vmax.f32 %v847_v5, 0.0 }
 0x3ca   : > { %v850_v11 = vpop.f32.mrb[23].mxu1  ;;  %v889_v14 = vmax.f32 %v1397_v6, 0.0  ;;  %v1801_v19 = vsel %vm896_vm1, %v888_v13, -inf }
 0x3cb   : > { %921 = vmax.xlane.f32.xlu0 %v901_v9  ;;  %927 = vmax.xlane.f32.xlu1 %v904_v10  ;;  %v887_v23 = vmax.f32 %v850_v11, 0.0  ;;  %v1811_v28 = vsel %vm896_vm1, %v886_v22, -inf }
 0x3cc   : > { %v1797_v18 = vsel %vm896_vm1, %v889_v14, -inf }
 0x3cd   : > { %v1807_v27 = vsel %vm896_vm1, %v887_v23, -inf }
 0x3cf   : > { %923 = vmax.xlane.f32.xlu1 %v902_v15  ;;  %915 = vmax.xlane.f32.xlu0 %v898_v16  ;;  %v1400_v17 = vpop.f32.mrb[24].mxu1 }
 0x3d0   : > { %v863_v20 = vpop.f32.mrb[25].mxu1  ;;  %v892_v31 = vmax.f32 %v1400_v17, 0.0 }
 0x3d1   : > { %v1401_v21 = vpop.f32.mrb[26].mxu1  ;;  %v890_v25 = vmax.f32 %v863_v20, 0.0 }
 0x3d2   : > { %v866_v24 = vpop.f32.mrb[27].mxu1  ;;  %v893_v32 = vmax.f32 %v1401_v21, 0.0  ;;  %v1831_v34 = vsel %vm896_vm1, %v892_v31, -inf }
 0x3d3   : > { %935 = vmax.xlane.f32.xlu1 %v1797_v18  ;;  %933 = vmax.xlane.f32.xlu0 %v1801_v19  ;;  %v891_v26 = vmax.f32 %v866_v24, 0.0  ;;  %v1821_v30 = vsel %vm896_vm1, %v890_v25, -inf }
 0x3d4   : > { %v1827_v33 = vsel %vm896_vm1, %v893_v32, -inf }
 0x3d5   : > { %v1817_v29 = vsel %vm896_vm1, %v891_v26, -inf }
 0x3d7   : > { %931 = vmax.xlane.f32.xlu1 %v1807_v27  ;;  %929 = vmax.xlane.f32.xlu0 %v1811_v28 }
 0x3db   : > { %939 = vmax.xlane.f32.xlu1 %v1817_v29  ;;  %937 = vmax.xlane.f32.xlu0 %v1821_v30 }
 0x3df   : > { %943 = vmax.xlane.f32.xlu1 %v1827_v33  ;;  %941 = vmax.xlane.f32.xlu0 %v1831_v34 }
 0x450   : > { %v926_v35 = vpop.xlane.xlu0 %925  ;;  %v918_v12 = vpop.xlane.xlu1 %917 }
 0x451   : > { %v951_v36 = vsub.f32 %v903_v45, %v926_v35  ;;  %v947_v37 = vsub.f32 %v899_v46, %v918_v12 }
 0x453   : > { %v965_v38 = vmul.f32 1.442695, %v947_v37  ;;  %v973_v39 = vmul.f32 1.442695, %v951_v36 }
 0x454   : > { %v914_v41 = vpop.xlane.xlu0 %913  ;;  %v920_v47 = vpop.xlane.xlu1 %919 }
 0x455   : > { %v945_v48 = vsub.f32 %v897_v2, %v914_v41  ;;  %v948_v49 = vsub.f32 %v900_v3, %v920_v47  ;;  %1483 = vpow2.f32 %v965_v38 }
 0x456   : > { %1485 = vpow2.f32 %v973_v39 }
 0x457   : > { %v967_v50 = vmul.f32 1.442695, %v948_v49  ;;  %v961_v51 = vmul.f32 1.442695, %v945_v48 }
 0x458   : > { %v922_v52 = vpop.xlane.xlu0 %921  ;;  %v928_v53 = vpop.xlane.xlu1 %927 }
 0x459   : > { %v949_v54 = vsub.f32 %v901_v9, %v922_v52  ;;  %v952_v56 = vsub.f32 %v904_v10, %v928_v53  ;;  %1487 = vpow2.f32 %v967_v50 }
 0x45a   : > { %1489 = vpow2.f32 %v961_v51 }
 0x45b   : > { %v975_v57 = vmul.f32 1.442695, %v952_v56  ;;  %v969_v58 = vmul.f32 1.442695, %v949_v54 }
 0x45c   : > { %v924_v59 = vpop.xlane.xlu1 %923  ;;  %v916_v40 = vpop.xlane.xlu0 %915 }
 0x45d   : > { %v950_v60 = vsub.f32 %v902_v15, %v924_v59  ;;  %v946_v42 = vsub.f32 %v898_v16, %v916_v40  ;;  %1491 = vpow2.f32 %v975_v57 }
 0x45e   : > { %1493 = vpow2.f32 %v969_v58 }
 0x45f   : > { %v963_v61 = vmul.f32 1.442695, %v946_v42  ;;  %v1484_v43 = vpop.eup %1483  ;;  %v971_v62 = vmul.f32 1.442695, %v950_v60 }
 0x460   : > { %v936_v44 = vpop.xlane.xlu1 %935  ;;  %v934_v63 = vpop.xlane.xlu0 %933  ;;  %v1839_v0 = vsel %vm896_vm1, %v1484_v43, 0.0 }
 0x461   : > { %v956_v45 = vsub.f32 %v1797_v18, %v936_v44  ;;  %v955_v46 = vsub.f32 %v1801_v19, %v934_v63  ;;  %v1486_v1 = vpop.eup %1485  ;;  %1495 = vpow2.f32 %v963_v61  ;;  %1013 = vadd.xlane.f32.xlu0 %v1839_v0 }
 0x462   : > { %1497 = vpow2.f32 %v971_v62  ;;  %v1850_v10 = vsel %vm896_vm1, %v1486_v1, 0.0 }
 0x463   : > { %v981_v2 = vmul.f32 1.442695, %v955_v46  ;;  %v1488_v3 = vpop.eup %1487  ;;  %v983_v4 = vmul.f32 1.442695, %v956_v45 }
 0x464   : > { %v932_v5 = vpop.xlane.xlu1 %931  ;;  %v930_v6 = vpop.xlane.xlu0 %929  ;;  %v1846_v9 = vsel %vm896_vm1, %v1488_v3, 0.0 }
 0x465   : > { %v954_v7 = vsub.f32 %v1807_v27, %v932_v5  ;;  %v953_v8 = vsub.f32 %v1811_v28, %v930_v6  ;;  %v1490_v11 = vpop.eup %1489  ;;  %1499 = vpow2.f32 %v981_v2  ;;  %1015 = vadd.xlane.f32.xlu1 %v1846_v9  ;;  %1021 = vadd.xlane.f32.xlu0 %v1850_v10 }
 0x466   : > { %1501 = vpow2.f32 %v983_v4  ;;  %v1862_v21 = vsel %vm896_vm1, %v1490_v11, 0.0 }
 0x467   : > { %v977_v13 = vmul.f32 1.442695, %v953_v8  ;;  %v1492_v14 = vpop.eup %1491  ;;  %v979_v15 = vmul.f32 1.442695, %v954_v7 }
 0x468   : > { %v940_v16 = vpop.xlane.xlu1 %939  ;;  %v938_v17 = vpop.xlane.xlu0 %937  ;;  %v1858_v20 = vsel %vm896_vm1, %v1492_v14, 0.0 }
 0x469   : > { %v958_v18 = vsub.f32 %v1817_v29, %v940_v16  ;;  %v957_v19 = vsub.f32 %v1821_v30, %v938_v17  ;;  %v1494_v22 = vpop.eup %1493  ;;  %1503 = vpow2.f32 %v977_v13  ;;  %1023 = vadd.xlane.f32.xlu1 %v1858_v20  ;;  %1009 = vadd.xlane.f32.xlu0 %v1862_v21 }
 0x46a   : > { %1505 = vpow2.f32 %v979_v15  ;;  %v1870_v30 = vsel %vm896_vm1, %v1494_v22, 0.0 }
 0x46b   : > { %v985_v23 = vmul.f32 1.442695, %v957_v19  ;;  %v1496_v24 = vpop.eup %1495  ;;  %v987_v25 = vmul.f32 1.442695, %v958_v18 }
 0x46c   : > { %v944_v26 = vpop.xlane.xlu1 %943  ;;  %v942_v27 = vpop.xlane.xlu0 %941  ;;  %v1874_v31 = vsel %vm896_vm1, %v1496_v24, 0.0 }
 0x46d   : > { %v960_v28 = vsub.f32 %v1827_v33, %v944_v26  ;;  %v959_v29 = vsub.f32 %v1831_v34, %v942_v27  ;;  %v1498_v32 = vpop.eup %1497  ;;  %1507 = vpow2.f32 %v985_v23  ;;  %1017 = vadd.xlane.f32.xlu0 %v1870_v30  ;;  %1011 = vadd.xlane.f32.xlu1 %v1874_v31 }
 0x46e   : > { %1509 = vpow2.f32 %v987_v25  ;;  %v1880_v34 = vsel %vm896_vm1, %v1498_v32, 0.0 }
 0x46f   : > { %v989_v35 = vmul.f32 1.442695, %v959_v29  ;;  %v1500_v12 = vpop.eup %1499  ;;  %v991_v33 = vmul.f32 1.442695, %v960_v28 }
 0x470   : > { %v1884_v36 = vsel %vm896_vm1, %v1500_v12, 0.0  ;;  %v1502_v37 = vpop.eup %1501 }
 0x471   : > { %1511 = vpow2.f32 %v989_v35  ;;  %1019 = vadd.xlane.f32.xlu1 %v1880_v34  ;;  %1029 = vadd.xlane.f32.xlu0 %v1884_v36  ;;  %v1890_v39 = vsel %vm896_vm1, %v1502_v37, 0.0 }
 0x472   : > { %1513 = vpow2.f32 %v991_v33 }
 0x473   : > { %v1504_v38 = vpop.eup %1503 }
 0x474   : > { %v1894_v41 = vsel %vm896_vm1, %v1504_v38, 0.0  ;;  %v1506_v47 = vpop.eup %1505 }
 0x475   : > { %1031 = vadd.xlane.f32.xlu1 %v1890_v39  ;;  %1025 = vadd.xlane.f32.xlu0 %v1894_v41  ;;  %v1900_v49 = vsel %vm896_vm1, %v1506_v47, 0.0 }
 0x477   : > { %v1508_v48 = vpop.eup %1507 }
 0x478   : > { %v1904_v50 = vsel %vm896_vm1, %v1508_v48, 0.0  ;;  %v1510_v51 = vpop.eup %1509 }
 0x479   : > { %1027 = vadd.xlane.f32.xlu1 %v1900_v49  ;;  %1033 = vadd.xlane.f32.xlu0 %v1904_v50  ;;  %v1910_v53 = vsel %vm896_vm1, %v1510_v51, 0.0 }
 0x47b   : > { %v1512_v52 = vpop.eup %1511 }
 0x47c   : > { %v1914_v54 = vsel %vm896_vm1, %v1512_v52, 0.0  ;;  %v1514_v56 = vpop.eup %1513 }
 0x47d   : > { %1035 = vadd.xlane.f32.xlu1 %v1910_v53  ;;  %1037 = vadd.xlane.f32.xlu0 %v1914_v54  ;;  %v1920_v57 = vsel %vm896_vm1, %v1514_v56, 0.0 }
 0x481   : > { %1039 = vadd.xlane.f32.xlu1 %v1920_v57 }
 0x4ee   : > { %v1014_v58 = vpop.xlane.xlu0 %1013 }
 0x4ef   : > { %1515 = vrcp.f32 %v1014_v58 }
 0x4f2   : > { %v1016_v59 = vpop.xlane.xlu1 %1015  ;;  %v1022_v40 = vpop.xlane.xlu0 %1021 }
 0x4f3   : > { %1517 = vrcp.f32 %v1016_v59 }
 0x4f4   : > { %1519 = vrcp.f32 %v1022_v40 }
 0x4f6   : > { %v1024_v60 = vpop.xlane.xlu1 %1023  ;;  %v1010_v42 = vpop.xlane.xlu0 %1009 }
 0x4f7   : > { %1521 = vrcp.f32 %v1024_v60 }
 0x4f8   : > { %1523 = vrcp.f32 %v1010_v42 }
 0x4f9   : > { %v1516_v61 = vpop.eup %1515 }
 0x4fa   : > { %v1059_v55 = vmul.f32 %v1516_v61, %v1839_v0  ;;  %v1012_v43 = vpop.xlane.xlu1 %1011  ;;  %v1018_v62 = vpop.xlane.xlu0 %1017 }
 0x4fb   : > { %1525 = vrcp.f32 %v1012_v43 }
 0x4fc   : > { %1075 = vst [vmem:[%s1927_s10 + $0x10] sm:$0xff] %v1059_v55  ;;  %1527 = vrcp.f32 %v1018_v62 }
 0x4fd   : > { %v1518_v44 = vpop.eup %1517 }
 0x4fe   : > { %v1520_v63 = vpop.eup %1519  ;;  %v1060_v45 = vmul.f32 %v1518_v44, %v1846_v9  ;;  %v1020_v46 = vpop.xlane.xlu1 %1019 }
 0x4ff   : > { %v1030_v1 = vpop.xlane.xlu0 %1029  ;;  %v1063_v0 = vmul.f32 %v1520_v63, %v1850_v10  ;;  %1529 = vrcp.f32 %v1020_v46 }
 0x500   : > { %1076 = vst [vmem:[%s1927_s10 + $0x18] sm:$0xff] %v1060_v45  ;;  %1531 = vrcp.f32 %v1030_v1 }
 0x501   : > { %v1522_v2 = vpop.eup %1521  ;;  %1079 = vst [vmem:[%s1927_s10 + $0x30] sm:$0xff] %v1063_v0 }
 0x502   : > { %v1524_v3 = vpop.eup %1523  ;;  %v1064_v4 = vmul.f32 %v1522_v2, %v1858_v20  ;;  %v1032_v5 = vpop.xlane.xlu1 %1031 }
 0x503   : > { %v1026_v6 = vpop.xlane.xlu0 %1025  ;;  %v1057_v7 = vmul.f32 %v1524_v3, %v1862_v21  ;;  %1533 = vrcp.f32 %v1032_v5 }
 0x504   : > { %1080 = vst [vmem:[%s1927_s10 + $0x38] sm:$0xff] %v1064_v4  ;;  %1535 = vrcp.f32 %v1026_v6 }
 0x505   : > { %v1526_v8 = vpop.eup %1525  ;;  %1073 = vst [vmem:[%s1927_s10] sm:$0xff] %v1057_v7 }
 0x506   : > { %v1528_v9 = vpop.eup %1527  ;;  %v1058_v10 = vmul.f32 %v1526_v8, %v1874_v31  ;;  %v1028_v11 = vpop.xlane.xlu1 %1027 }
 0x507   : > { %v1034_v13 = vpop.xlane.xlu0 %1033  ;;  %v1061_v14 = vmul.f32 %v1528_v9, %v1870_v30  ;;  %1537 = vrcp.f32 %v1028_v11 }
 0x508   : > { %1074 = vst [vmem:[%s1927_s10 + $0x8] sm:$0xff] %v1058_v10  ;;  %1539 = vrcp.f32 %v1034_v13 }
 0x509   : > { %v1530_v15 = vpop.eup %1529  ;;  %1077 = vst [vmem:[%s1927_s10 + $0x20] sm:$0xff] %v1061_v14 }
 0x50a   : > { %v1532_v16 = vpop.eup %1531  ;;  %v1062_v17 = vmul.f32 %v1530_v15, %v1880_v34  ;;  %v1036_v18 = vpop.xlane.xlu1 %1035 }
 0x50b   : > { %v1038_v19 = vpop.xlane.xlu0 %1037  ;;  %v1067_v20 = vmul.f32 %v1532_v16, %v1884_v36  ;;  %1541 = vrcp.f32 %v1036_v18 }
 0x50c   : > { %1078 = vst [vmem:[%s1927_s10 + $0x28] sm:$0xff] %v1062_v17  ;;  %1543 = vrcp.f32 %v1038_v19 }
 0x50d   : > { %v1534_v21 = vpop.eup %1533  ;;  %1083 = vst [vmem:[%s1927_s10 + $0x50] sm:$0xff] %v1067_v20 }
 0x50e   : > { %v1536_v22 = vpop.eup %1535  ;;  %v1068_v23 = vmul.f32 %v1534_v21, %v1890_v39  ;;  %v1040_v24 = vpop.xlane.xlu1 %1039 }
 0x50f   : > { %v1065_v25 = vmul.f32 %v1536_v22, %v1894_v41  ;;  %1545 = vrcp.f32 %v1040_v24 }
 0x510   : > { %1084 = vst [vmem:[%s1927_s10 + $0x58] sm:$0xff] %v1068_v23 }
 0x511   : > { %v1538_v26 = vpop.eup %1537  ;;  %1081 = vst [vmem:[%s1927_s10 + $0x40] sm:$0xff] %v1065_v25 }
 0x512   : > { %v1540_v27 = vpop.eup %1539  ;;  %v1066_v28 = vmul.f32 %v1538_v26, %v1900_v49 }
 0x513   : > { %v1069_v29 = vmul.f32 %v1540_v27, %v1904_v50 }
 0x514   : > { %1082 = vst [vmem:[%s1927_s10 + $0x48] sm:$0xff] %v1066_v28 }
 0x515   : > { %v1542_v30 = vpop.eup %1541  ;;  %1085 = vst [vmem:[%s1927_s10 + $0x60] sm:$0xff] %v1069_v29 }
 0x516   : > { %v1544_v31 = vpop.eup %1543  ;;  %v1070_v32 = vmul.f32 %v1542_v30, %v1910_v53 }
 0x517   : > { %v1071_v35 = vmul.f32 %v1544_v31, %v1914_v54 }
 0x518   : > { %1086 = vst [vmem:[%s1927_s10 + $0x68] sm:$0xff] %v1070_v32 }
 0x519   : > { %v1546_v12 = vpop.eup %1545  ;;  %1087 = vst [vmem:[%s1927_s10 + $0x70] sm:$0xff] %v1071_v35 }
 0x51a   : > { %v1072_v33 = vmul.f32 %v1546_v12, %v1920_v57 }
 0x51c   : > { %1088 = vst [vmem:[%s1927_s10 + $0x78] sm:$0xff] %v1072_v33 }
 0x51d   : > { %1560 = shalt.err (!%p1557_p3)
}
 0x51e   : > { %s1561_s29 = scalar_lea.hbm %s1963_s20, 2048  ;;  %s1565_s6 = scalar_lea.hbm %s2016_s4, 8192 }
 0x51f   : > { %p1562_p4 = scmp.ne.s32.totalorder %s1963_s20, %s1561_s29  ;;  %p1566_p9 = scmp.lt.u32.totalorder %s1963_s20, %s2016_s4 }
 0x520   : > { %p1567_p10 = scmp.lt.u32.totalorder %s1565_s6, %s1561_s29  ;;  %p1569_p12 = scmp.lt.u32.totalorder %s1561_s29, %s1963_s20 }
 0x521   : > { %p1563_p7 = pnand %p1562_p4, %p1677_p5 }
 0x522   : > { %p1568_p11 = por %p1567_p10, %p1566_p9 }
 0x523   : > { %p1564_p8 = pneg %p1563_p7 }
 0x524   : > { %p1570_p13 = por %p1569_p12, %p1568_p11 }
 0x526   : > { %p1571_p0 = pnand %p1570_p13, %p1564_p8 }
 0x528   : > { %1574 = shalt.err (!%p1571_p0)
}
 0x529   : > { %s1612_s9 = smov 128   ;;  %s1613_s10 = smov 8  }
 0x52a   : > { %1418 = dma.vmem_to_hbm [thread:$0]  (%p1677_p5), %s1965_s12, 2048, %s1963_s20, %s1971_s19, %s1612_s9, %s1612_s9, %s1613_s10  }
 0x52b PF: > { %p1424_p1 = scmp.ge.s32.totalorder %s1609_s18, 2  ;;  %s1118_s11 = sand.u32 1, %s1597_s15  }
 0x52c   : > { %s1119_s13 = scalar_lea.sflag [#allocation3], %s1118_s11 }
 0x52d   : > { %p1421_p2 = pnand %p1424_p1, %p1681_p6 }
 0x52f   : > { %1592 = dma.done.wait (!%p1421_p2), %s1119_s13, 2048  }
 0x530   : > { %1594 = vsyncadd (!%p1421_p2), %s1119_s13, 4294965248  ;;  %p14_p3 = scmp.ge.s32.totalorder %s1664_s21, 6   ;;  %s2019_s15 = smov %s1601_s16 }
 0x531   : > { %s2020_s16 = smov %s1605_s17  ;;  %s2021_s17 = smov %s1675_s24 }
 0x532   : > { %s2022_s18 = smov %s1664_s21  ;;  %16 = sbr.rel (!%p14_p3) target bundleno = 3 (0x3), region = 74 }
 0x539   :  { %1124 = vsyncpa [#allocation3], 1 }
 0x53a   :  { %1126 = vsyncpa [#allocation3 + $0x1], 1 }

</bundles_post_ra>
